<compile_context>
chip_gen: v7x
topology: tpu7x:2x2x1
jax: 0.10.0
libtpu: 0.0.40
codegen_flags: <defaults>
</compile_context>

<pallas_src>
import jax
import jax.numpy as jnp
from jax import lax
from jax.experimental import pallas as pl
from jax.experimental.pallas import tpu as pltpu

LATENT_SIZE = 256
NUM_CLASSES = 3
NUM_PROTOTYPES = 4
PROTOTYPE_SIZE = 50
EPS_NORM = 1e-5   # nn.InstanceNorm1d default eps
EPS_LOG = 1e-5    # PWNet.epsilon

P_PAD = 64                        # per-prototype feature width padded to 64 lanes
D_ALL = NUM_PROTOTYPES * P_PAD    # 256 fused feature lanes (128-lane multiple)
G_PAD = 8                         # prototype count padded to a sublane multiple
OUT_PAD = 128                     # lane-dense output slab width


def pwnet_kernel(x_ref, w1_ref, b1_ref, w2_ref, b2_ref, proto_ref,
                 g_ref, gt_ref, lw_ref, o_ref):
    """x:(tb,256) w1:(256,256) b1:(1,256) w2:(256,256) b2:(1,256) proto:(1,256)
       g:(256,8) gt:(8,256) lw:(8,128) o:(tb,128)"""
    x = x_ref[...]                                                        # (tb, 256)

    # Fused layer-1 for all 4 prototypes: single MXU push of the LHS.
    h = jnp.dot(x, w1_ref[...], preferred_element_type=jnp.float32) + b1_ref[...]

    # Per-prototype InstanceNorm statistics, one-pass (E[h], E[h^2]) via
    # group-indicator matmuls; padded lanes of h are exactly zero so no masking needed.
    inv_n = 1.0 / PROTOTYPE_SIZE
    gsum = jnp.dot(h, g_ref[...], preferred_element_type=jnp.float32)     # (tb, 8)
    gsq = jnp.dot(h * h, g_ref[...], preferred_element_type=jnp.float32)  # (tb, 8)
    mu = gsum * inv_n
    var = gsq * inv_n - mu * mu                                           # biased variance
    inv_std = lax.rsqrt(var + EPS_NORM)

    # Broadcast the per-group stats back to the 256 fused lanes (tiny K=8 matmul).
    mu_full = jnp.dot(mu, gt_ref[...], preferred_element_type=jnp.float32)       # (tb,256)
    inv_full = jnp.dot(inv_std, gt_ref[...], preferred_element_type=jnp.float32)  # (tb,256)
    hn = jnp.maximum((h - mu_full) * inv_full, 0.0)                       # norm + ReLU

    # Fused (block-diagonal) layer-2; zero rows/cols keep padded lanes exactly zero.
    z = jnp.dot(hn, w2_ref[...], preferred_element_type=jnp.float32) + b2_ref[...]

    # L2 distance to the precomputed prototype vectors, reduced per prototype group.
    diff = z - proto_ref[...]
    l2 = jnp.dot(diff * diff, g_ref[...], preferred_element_type=jnp.float32)  # (tb, 8)
    act = jnp.log((l2 + 1.0) / (l2 + EPS_LOG))

    # Final 4x3 linear (padded to 8x128 so the store is lane-dense), then tanh/relu.
    logits = jnp.dot(act, lw_ref[...], preferred_element_type=jnp.float32)      # (tb,128)
    col = lax.broadcasted_iota(jnp.int32, logits.shape, 1)
    o_ref[...] = jnp.where(col == 0, jnp.tanh(logits), jnp.maximum(logits, 0.0))


def _transform_ref(z, w1t_i, b1_i, w2t_i, b2_i):
    """Single-prototype transform in pure JAX (matches PyTorch semantics)."""
    h = z @ w1t_i + b1_i
    mu = h.mean(axis=1, keepdims=True)
    var = ((h - mu) ** 2).mean(axis=1, keepdims=True)
    h = (h - mu) / jnp.sqrt(var + EPS_NORM)
    h = jnp.maximum(h, 0.0)
    return h @ w2t_i + b2_i


def _build_fused_params(params):
    hx, w1t, b1, w2t, b2, lwt = params

    w1_all = jnp.zeros((LATENT_SIZE, D_ALL), jnp.float32)
    b1_all = jnp.zeros((1, D_ALL), jnp.float32)
    w2_all = jnp.zeros((D_ALL, D_ALL), jnp.float32)
    b2_all = jnp.zeros((1, D_ALL), jnp.float32)
    proto_all = jnp.zeros((1, D_ALL), jnp.float32)
    g = jnp.zeros((D_ALL, G_PAD), jnp.float32)

    for i in range(NUM_PROTOTYPES):
        lo = i * P_PAD
        hi = lo + PROTOTYPE_SIZE
        w1_all = w1_all.at[:, lo:hi].set(w1t[i])
        b1_all = b1_all.at[0, lo:hi].set(b1[i])
        w2_all = w2_all.at[lo:hi, lo:hi].set(w2t[i])
        b2_all = b2_all.at[0, lo:hi].set(b2[i])
        # prototype vector computed once, outside the kernel
        proto_i = _transform_ref(hx[i:i + 1], w1t[i], b1[i], w2t[i], b2[i])   # (1, 50)
        proto_all = proto_all.at[0, lo:hi].set(proto_i[0])
        g = g.at[lo:hi, i].set(1.0)

    gt = jnp.transpose(g)                                         # (8, 256)
    lwt_pad = jnp.zeros((G_PAD, OUT_PAD), jnp.float32)
    lwt_pad = lwt_pad.at[:NUM_PROTOTYPES, :NUM_CLASSES].set(lwt)
    return w1_all, b1_all, w2_all, b2_all, proto_all, g, gt, lwt_pad


def pwnet_forward(x, params, tb=512):
    B = x.shape[0]
    w1_all, b1_all, w2_all, b2_all, proto_all, g, gt, lwt_pad = _build_fused_params(params)

    # Batch tile: multiple of 8, no larger than the (8-padded) batch.
    tb = max(8, min(int(tb), ((B + 7) // 8) * 8))
    tb = ((tb + 7) // 8) * 8
    B_pad = ((B + tb - 1) // tb) * tb
    if B_pad != B:
        x = jnp.pad(x, ((0, B_pad - B), (0, 0)))
    grid = (B_pad // tb,)

    out = pl.pallas_call(
        pwnet_kernel,
        out_shape=jax.ShapeDtypeStruct((B_pad, OUT_PAD), jnp.float32),
        grid_spec=pltpu.PrefetchScalarGridSpec(
            num_scalar_prefetch=0,
            grid=grid,
            in_specs=[
                pl.BlockSpec((tb, LATENT_SIZE), lambda b: (b, 0)),
                pl.BlockSpec((LATENT_SIZE, D_ALL), lambda b: (0, 0)),
                pl.BlockSpec((1, D_ALL), lambda b: (0, 0)),
                pl.BlockSpec((D_ALL, D_ALL), lambda b: (0, 0)),
                pl.BlockSpec((1, D_ALL), lambda b: (0, 0)),
                pl.BlockSpec((1, D_ALL), lambda b: (0, 0)),
                pl.BlockSpec((D_ALL, G_PAD), lambda b: (0, 0)),
                pl.BlockSpec((G_PAD, D_ALL), lambda b: (0, 0)),
                pl.BlockSpec((G_PAD, OUT_PAD), lambda b: (0, 0)),
            ],
            out_specs=pl.BlockSpec((tb, OUT_PAD), lambda b: (b, 0)),
        ),
        compiler_params=pltpu.CompilerParams(
            dimension_semantics=("parallel",)),
    )(x, w1_all, b1_all, w2_all, b2_all, proto_all, g, gt, lwt_pad)

    return out[:B, :NUM_CLASSES]


def pwnet_reference(x, params):
    """Pure-JAX reference mirroring the PyTorch forward (per-prototype, unfused)."""
    hx, w1t, b1, w2t, b2, lwt = params
    acts = []
    for i in range(NUM_PROTOTYPES):
        proto = _transform_ref(hx[i:i + 1], w1t[i], b1[i], w2t[i], b2[i])
        z = _transform_ref(x, w1t[i], b1[i], w2t[i], b2[i])
        l2 = ((z - proto) ** 2).sum(axis=1)
        acts.append(jnp.log((l2 + 1.0) / (l2 + EPS_LOG)))
    p_acts = jnp.stack(acts, axis=1)
    logits = p_acts @ lwt
    return jnp.concatenate(
        [jnp.tanh(logits[:, :1]), jnp.maximum(logits[:, 1:], 0.0)], axis=1)


def init_params(key):
    ks = jax.random.split(key, 5)
    hx = jax.random.normal(ks[0], (NUM_PROTOTYPES, LATENT_SIZE), jnp.float32)
    w1t = jax.random.normal(
        ks[1], (NUM_PROTOTYPES, LATENT_SIZE, PROTOTYPE_SIZE), jnp.float32
    ) * (1.0 / jnp.sqrt(LATENT_SIZE))
    b1 = 0.01 * jax.random.normal(ks[2], (NUM_PROTOTYPES, PROTOTYPE_SIZE), jnp.float32)
    w2t = jax.random.normal(
        ks[3], (NUM_PROTOTYPES, PROTOTYPE_SIZE, PROTOTYPE_SIZE), jnp.float32
    ) * (1.0 / jnp.sqrt(PROTOTYPE_SIZE))
    b2 = 0.01 * jax.random.normal(ks[4], (NUM_PROTOTYPES, PROTOTYPE_SIZE), jnp.float32)
    # fixed "human concept" linear weights; logits = p_acts @ custom_weight_matrix
    lwt = jnp.array([[-1.0, 0.0, 0.0],
                     [1.0, 0.0, 0.0],
                     [0.0, 1.0, 0.0],
                     [0.0, 0.0, 1.0]], dtype=jnp.float32)
    return hx, w1t, b1, w2t, b2, lwt


if __name__ == "__main__":
    key = jax.random.PRNGKey(0)
    k_params, k_x = jax.random.split(key)
    params = init_params(k_params)

    B = 52                                  # non-multiple batch: exercises pad + multi-step grid
    x = jax.random.normal(k_x, (B, LATENT_SIZE), jnp.float32)

    out = pwnet_forward(x, params, tb=16)   # grid of 4 steps at this small test size
    out = jax.block_until_ready(out)

    ref = pwnet_reference(x, params)
    assert out.shape == (B, NUM_CLASSES)
    max_err = float(jnp.max(jnp.abs(out - ref)))
    assert jnp.allclose(out, ref, rtol=1e-3, atol=1e-4), (max_err, out[:2], ref[:2])
    print("KERNEL_OK")
</pallas_src>

<mosaic_0001>
module attributes {stable_mosaic.version = 11 : i64} {
  func.func @pwnet_kernel(%arg0: i32, %arg1: memref<16x256xf32, #tpu.memory_space<vmem>>, %arg2: memref<256x256xf32, #tpu.memory_space<vmem>>, %arg3: memref<1x256xf32, #tpu.memory_space<vmem>>, %arg4: memref<256x256xf32, #tpu.memory_space<vmem>>, %arg5: memref<1x256xf32, #tpu.memory_space<vmem>>, %arg6: memref<1x256xf32, #tpu.memory_space<vmem>>, %arg7: memref<256x8xf32, #tpu.memory_space<vmem>>, %arg8: memref<8x256xf32, #tpu.memory_space<vmem>>, %arg9: memref<8x128xf32, #tpu.memory_space<vmem>>, %arg10: memref<16x128xf32, #tpu.memory_space<vmem>>) attributes {dimension_semantics = [#tpu.dimension_semantics<parallel>], iteration_bounds = array<i64: 4>, scalar_prefetch = 0 : i64, scratch_operands = 0 : i64, tpu.core_type = #tpu.core_type<tc>, window_params = [{transform_indices = @transform_0, window_bounds = array<i64: 16, 256>}, {pipeline_mode = #tpu.pipeline_mode<synchronous>, transform_indices = @transform_1, window_bounds = array<i64: 256, 256>}, {pipeline_mode = #tpu.pipeline_mode<synchronous>, transform_indices = @transform_2, window_bounds = array<i64: 1, 256>}, {pipeline_mode = #tpu.pipeline_mode<synchronous>, transform_indices = @transform_3, window_bounds = array<i64: 256, 256>}, {pipeline_mode = #tpu.pipeline_mode<synchronous>, transform_indices = @transform_4, window_bounds = array<i64: 1, 256>}, {pipeline_mode = #tpu.pipeline_mode<synchronous>, transform_indices = @transform_5, window_bounds = array<i64: 1, 256>}, {pipeline_mode = #tpu.pipeline_mode<synchronous>, transform_indices = @transform_6, window_bounds = array<i64: 256, 8>}, {pipeline_mode = #tpu.pipeline_mode<synchronous>, transform_indices = @transform_7, window_bounds = array<i64: 8, 256>}, {pipeline_mode = #tpu.pipeline_mode<synchronous>, transform_indices = @transform_8, window_bounds = array<i64: 8, 128>}, {transform_indices = @transform_9, window_bounds = array<i64: 16, 128>}]} {
    %c0 = arith.constant 0 : index
    %c0_0 = arith.constant 0 : index
    %0 = vector.load %arg1[%c0, %c0_0] : memref<16x256xf32, #tpu.memory_space<vmem>>, vector<16x256xf32>
    %c0_1 = arith.constant 0 : index
    %c0_2 = arith.constant 0 : index
    %1 = vector.load %arg2[%c0_1, %c0_2] : memref<256x256xf32, #tpu.memory_space<vmem>>, vector<256x256xf32>
    %cst = arith.constant dense<0.000000e+00> : vector<16x256xf32>
    %2 = tpu.matmul %0, %1, %cst {dimension_numbers = #tpu.dot_dimension_numbers<[1], [0], [0], [1], [0, 0, 1, 1], [], []>} : vector<16x256xf32>, vector<256x256xf32>, vector<16x256xf32> -> vector<16x256xf32>
    %c0_3 = arith.constant 0 : index
    %c0_4 = arith.constant 0 : index
    %3 = vector.load %arg3[%c0_3, %c0_4] : memref<1x256xf32, #tpu.memory_space<vmem>>, vector<1x256xf32>
    %4 = vector.broadcast %3 : vector<1x256xf32> to vector<16x256xf32>
    %5 = arith.addf %2, %4 : vector<16x256xf32>
    %c0_5 = arith.constant 0 : index
    %c0_6 = arith.constant 0 : index
    %6 = vector.load %arg7[%c0_5, %c0_6] : memref<256x8xf32, #tpu.memory_space<vmem>>, vector<256x8xf32>
    %cst_7 = arith.constant dense<0.000000e+00> : vector<16x8xf32>
    %7 = tpu.matmul %5, %6, %cst_7 {dimension_numbers = #tpu.dot_dimension_numbers<[1], [0], [0], [1], [0, 0, 1, 1], [], []>} : vector<16x256xf32>, vector<256x8xf32>, vector<16x8xf32> -> vector<16x8xf32>
    %8 = arith.mulf %5, %5 : vector<16x256xf32>
    %c0_8 = arith.constant 0 : index
    %c0_9 = arith.constant 0 : index
    %9 = vector.load %arg7[%c0_8, %c0_9] : memref<256x8xf32, #tpu.memory_space<vmem>>, vector<256x8xf32>
    %cst_10 = arith.constant dense<0.000000e+00> : vector<16x8xf32>
    %10 = tpu.matmul %8, %9, %cst_10 {dimension_numbers = #tpu.dot_dimension_numbers<[1], [0], [0], [1], [0, 0, 1, 1], [], []>} : vector<16x256xf32>, vector<256x8xf32>, vector<16x8xf32> -> vector<16x8xf32>
    %cst_11 = arith.constant 2.000000e-02 : f32
    %11 = vector.broadcast %cst_11 : f32 to vector<16x8xf32>
    %12 = arith.mulf %7, %11 : vector<16x8xf32>
    %cst_12 = arith.constant 2.000000e-02 : f32
    %13 = vector.broadcast %cst_12 : f32 to vector<16x8xf32>
    %14 = arith.mulf %10, %13 : vector<16x8xf32>
    %15 = arith.mulf %12, %12 : vector<16x8xf32>
    %16 = arith.subf %14, %15 : vector<16x8xf32>
    %cst_13 = arith.constant 9.99999974E-6 : f32
    %17 = vector.broadcast %cst_13 : f32 to vector<16x8xf32>
    %18 = arith.addf %16, %17 : vector<16x8xf32>
    %19 = math.rsqrt %18 : vector<16x8xf32>
    %c0_14 = arith.constant 0 : index
    %c0_15 = arith.constant 0 : index
    %20 = vector.load %arg8[%c0_14, %c0_15] : memref<8x256xf32, #tpu.memory_space<vmem>>, vector<8x256xf32>
    %cst_16 = arith.constant dense<0.000000e+00> : vector<16x256xf32>
    %21 = tpu.matmul %12, %20, %cst_16 {dimension_numbers = #tpu.dot_dimension_numbers<[1], [0], [0], [1], [0, 0, 1, 1], [], []>} : vector<16x8xf32>, vector<8x256xf32>, vector<16x256xf32> -> vector<16x256xf32>
    %c0_17 = arith.constant 0 : index
    %c0_18 = arith.constant 0 : index
    %22 = vector.load %arg8[%c0_17, %c0_18] : memref<8x256xf32, #tpu.memory_space<vmem>>, vector<8x256xf32>
    %cst_19 = arith.constant dense<0.000000e+00> : vector<16x256xf32>
    %23 = tpu.matmul %19, %22, %cst_19 {dimension_numbers = #tpu.dot_dimension_numbers<[1], [0], [0], [1], [0, 0, 1, 1], [], []>} : vector<16x8xf32>, vector<8x256xf32>, vector<16x256xf32> -> vector<16x256xf32>
    %24 = arith.subf %5, %21 : vector<16x256xf32>
    %25 = arith.mulf %24, %23 : vector<16x256xf32>
    %cst_20 = arith.constant 0.000000e+00 : f32
    %26 = vector.broadcast %cst_20 : f32 to vector<16x256xf32>
    %27 = arith.maximumf %25, %26 : vector<16x256xf32>
    %c0_21 = arith.constant 0 : index
    %c0_22 = arith.constant 0 : index
    %28 = vector.load %arg4[%c0_21, %c0_22] : memref<256x256xf32, #tpu.memory_space<vmem>>, vector<256x256xf32>
    %cst_23 = arith.constant dense<0.000000e+00> : vector<16x256xf32>
    %29 = tpu.matmul %27, %28, %cst_23 {dimension_numbers = #tpu.dot_dimension_numbers<[1], [0], [0], [1], [0, 0, 1, 1], [], []>} : vector<16x256xf32>, vector<256x256xf32>, vector<16x256xf32> -> vector<16x256xf32>
    %c0_24 = arith.constant 0 : index
    %c0_25 = arith.constant 0 : index
    %30 = vector.load %arg5[%c0_24, %c0_25] : memref<1x256xf32, #tpu.memory_space<vmem>>, vector<1x256xf32>
    %31 = vector.broadcast %30 : vector<1x256xf32> to vector<16x256xf32>
    %32 = arith.addf %29, %31 : vector<16x256xf32>
    %c0_26 = arith.constant 0 : index
    %c0_27 = arith.constant 0 : index
    %33 = vector.load %arg6[%c0_26, %c0_27] : memref<1x256xf32, #tpu.memory_space<vmem>>, vector<1x256xf32>
    %34 = vector.broadcast %33 : vector<1x256xf32> to vector<16x256xf32>
    %35 = arith.subf %32, %34 : vector<16x256xf32>
    %36 = arith.mulf %35, %35 : vector<16x256xf32>
    %c0_28 = arith.constant 0 : index
    %c0_29 = arith.constant 0 : index
    %37 = vector.load %arg7[%c0_28, %c0_29] : memref<256x8xf32, #tpu.memory_space<vmem>>, vector<256x8xf32>
    %cst_30 = arith.constant dense<0.000000e+00> : vector<16x8xf32>
    %38 = tpu.matmul %36, %37, %cst_30 {dimension_numbers = #tpu.dot_dimension_numbers<[1], [0], [0], [1], [0, 0, 1, 1], [], []>} : vector<16x256xf32>, vector<256x8xf32>, vector<16x8xf32> -> vector<16x8xf32>
    %cst_31 = arith.constant 1.000000e+00 : f32
    %39 = vector.broadcast %cst_31 : f32 to vector<16x8xf32>
    %40 = arith.addf %38, %39 : vector<16x8xf32>
    %cst_32 = arith.constant 9.99999974E-6 : f32
    %41 = vector.broadcast %cst_32 : f32 to vector<16x8xf32>
    %42 = arith.addf %38, %41 : vector<16x8xf32>
    %43 = arith.divf %40, %42 : vector<16x8xf32>
    %44 = math.log %43 : vector<16x8xf32>
    %c0_33 = arith.constant 0 : index
    %c0_34 = arith.constant 0 : index
    %45 = vector.load %arg9[%c0_33, %c0_34] : memref<8x128xf32, #tpu.memory_space<vmem>>, vector<8x128xf32>
    %cst_35 = arith.constant dense<0.000000e+00> : vector<16x128xf32>
    %46 = tpu.matmul %44, %45, %cst_35 {dimension_numbers = #tpu.dot_dimension_numbers<[1], [0], [0], [1], [0, 0, 1, 1], [], []>} : vector<16x8xf32>, vector<8x128xf32>, vector<16x128xf32> -> vector<16x128xf32>
    %47 = tpu.iota {dimensions = array<i32: 1>} : vector<16x128xi32>
    %c0_i32 = arith.constant 0 : i32
    %48 = vector.broadcast %c0_i32 : i32 to vector<16x128xi32>
    %49 = arith.cmpi eq, %47, %48 : vector<16x128xi32>
    %50 = math.tanh %46 : vector<16x128xf32>
    %cst_36 = arith.constant 0.000000e+00 : f32
    %51 = vector.broadcast %cst_36 : f32 to vector<16x128xf32>
    %52 = arith.maximumf %46, %51 : vector<16x128xf32>
    %53 = arith.select %49, %50, %52 : vector<16x128xi1>, vector<16x128xf32>
    %c0_37 = arith.constant 0 : index
    %c0_38 = arith.constant 0 : index
    %54 = vector.load %arg10[%c0_37, %c0_38] : memref<16x128xf32, #tpu.memory_space<vmem>>, vector<16x128xf32>
    tpu.vector_store %arg10[%c0_37, %c0_38], %53 {strides = array<i32>} : memref<16x128xf32, #tpu.memory_space<vmem>>, vector<16x128xf32>,
    return
  }
  func.func @transform_0(%arg0: i32) -> (i32, i32) {
    %c0_i32 = arith.constant 0 : i32
    %c0_i32_0 = arith.constant 0 : i32
    return %arg0, %c0_i32 : i32, i32
  }
  func.func @transform_1(%arg0: i32) -> (i32, i32) {
    %c0_i32 = arith.constant 0 : i32
    %c0_i32_0 = arith.constant 0 : i32
    %c0_i32_1 = arith.constant 0 : i32
    return %c0_i32, %c0_i32_0 : i32, i32
  }
  func.func @transform_2(%arg0: i32) -> (i32, i32) {
    %c0_i32 = arith.constant 0 : i32
    %c0_i32_0 = arith.constant 0 : i32
    %c0_i32_1 = arith.constant 0 : i32
    return %c0_i32, %c0_i32_0 : i32, i32
  }
  func.func @transform_3(%arg0: i32) -> (i32, i32) {
    %c0_i32 = arith.constant 0 : i32
    %c0_i32_0 = arith.constant 0 : i32
    %c0_i32_1 = arith.constant 0 : i32
    return %c0_i32, %c0_i32_0 : i32, i32
  }
  func.func @transform_4(%arg0: i32) -> (i32, i32) {
    %c0_i32 = arith.constant 0 : i32
    %c0_i32_0 = arith.constant 0 : i32
    %c0_i32_1 = arith.constant 0 : i32
    return %c0_i32, %c0_i32_0 : i32, i32
  }
  func.func @transform_5(%arg0: i32) -> (i32, i32) {
    %c0_i32 = arith.constant 0 : i32
    %c0_i32_0 = arith.constant 0 : i32
    %c0_i32_1 = arith.constant 0 : i32
    return %c0_i32, %c0_i32_0 : i32, i32
  }
  func.func @transform_6(%arg0: i32) -> (i32, i32) {
    %c0_i32 = arith.constant 0 : i32
    %c0_i32_0 = arith.constant 0 : i32
    %c0_i32_1 = arith.constant 0 : i32
    return %c0_i32, %c0_i32_0 : i32, i32
  }
  func.func @transform_7(%arg0: i32) -> (i32, i32) {
    %c0_i32 = arith.constant 0 : i32
    %c0_i32_0 = arith.constant 0 : i32
    %c0_i32_1 = arith.constant 0 : i32
    return %c0_i32, %c0_i32_0 : i32, i32
  }
  func.func @transform_8(%arg0: i32) -> (i32, i32) {
    %c0_i32 = arith.constant 0 : i32
    %c0_i32_0 = arith.constant 0 : i32
    %c0_i32_1 = arith.constant 0 : i32
    return %c0_i32, %c0_i32_0 : i32, i32
  }
  func.func @transform_9(%arg0: i32) -> (i32, i32) {
    %c0_i32 = arith.constant 0 : i32
    %c0_i32_0 = arith.constant 0 : i32
    return %arg0, %c0_i32 : i32, i32
  }
}

</mosaic_0001>

<bundles_post_ra>
// kernel: tpu_custom_call.1
= control target key start
LH: loop header
LB: loop body
LE: loop exit
PB: predicated region body
PF: predicated region fallthrough
CT: control target
= control target key end

     0   :  { %14 = vsyncpa [#allocation3], 0  ;;  %s2408_s0 = inlined_call_operand.vmem [shape: f32[64,256], index: 0, kind: input, shape index: {}]   ;;  %s2409_s1 = inlined_call_operand.hbm [shape: f32[256,256], index: 1, kind: input, shape index: {}]   ;;  %s2410_s2 = inlined_call_operand.vmem [shape: f32[1,256], index: 2, kind: input, shape index: {}]   ;;  %s2411_s3 = inlined_call_operand.hbm [shape: f32[256,256], index: 3, kind: input, shape index: {}]   ;;  %s2412_s4 = inlined_call_operand.vmem [shape: f32[1,256], index: 4, kind: input, shape index: {}]   ;;  %s2413_s5 = inlined_call_operand.vmem [shape: f32[1,256], index: 5, kind: input, shape index: {}]   ;;  %s2414_s6 = inlined_call_operand.vmem [shape: f32[256,8], index: 6, kind: input, shape index: {}]   ;;  %s2415_s7 = inlined_call_operand.vmem [shape: f32[8,256], index: 7, kind: input, shape index: {}]   ;;  %s2416_s8 = inlined_call_operand.vmem [shape: f32[8,128], index: 8, kind: input, shape index: {}]   ;;  %s2417_s9 = inlined_call_operand.hbm [shape: f32[64,128], index: 9, kind: output, shape index: {}]  }
   0x1   :  { %15 = vsyncpa [#allocation6], 0 }
   0x2   :  { %16 = vsyncpa [#allocation4], 0 }
   0x3   :  { %18 = vsyncpa [#allocation4 + $0x1], 0  ;;  %s1992_s30 = smov 0   ;;  %s1994_s10 = smov 0  }
   0x4   :  { %s1996_s11 = smov 0   ;;  %s1998_s12 = smov 0  }
   0x5 LB: > { %2424 = sst [smem:[#allocation11_spill]] %s1928_s11  ;;  %s2013_s13 = sadd.s32 4294967295, %s1932_s12   ;;  %s1932_s12 = sphi %s1998_s12, %s2438_s12   ;;  %s1928_s11 = sphi %s1996_s11, %s2440_s11   ;;  %s1924_s10 = sphi %s1994_s10, %s2442_s10   ;;  %s1920_s30 = sphi %s1992_s30, %s2441_s30  }
   0x6   : > { %s1354_s14 = sadd.s32 4294967294, %s1932_s12   ;;  %s2017_s15 = sadd.s32 1, %s1932_s12  }
   0x7   : > { %2425 = sst [smem:[#allocation12_spill]] %s2017_s15  ;;  %s225_s16 = sadd.s32 1, %s1928_s11 }
   0x8   : > { %s222_s17 = ssub.s32 %s1932_s12, %s2017_s15  ;;  %p235_p0 = scmp.ne.s32.totalorder %s1928_s11, %s1924_s10 }
   0x9   : > { %p223_p1 = scmp.eq.s32.totalorder %s222_s17, 0  ;;  %p236_p2 = scmp.eq.s32.totalorder %s2013_s13, 3 }
   0xa   : > { %p241_p3 = scmp.ne.s32.totalorder %s1924_s10, %s1920_s30  ;;  %p242_p4 = scmp.eq.s32.totalorder %s1354_s14, 3 }
   0xb   : > { %s2028_s18 = scalar_select %p223_p1, %s1928_s11, %s225_s16  }
   0xc   : > { %p2030_p5 = por %p236_p2, %p235_p0  ;;  %p2034_p6 = por %p242_p4, %p241_p3 }
   0xd   : > { %2426 = sst [smem:[#allocation13_spill]] %s2028_s18  ;;  %p1355_p7 = scmp.ge.s32.totalorder %s1932_s12, 1 }
   0xe   : > { %s2427_s19 = scalar_select %p2030_p5, 1, 0 }
   0xf   : > { %s2428_s20 = scalar_select %p2034_p6, 1, 0 }
  0x10   : > { %p249_p8 = scmp.lt.s32.totalorder %s1932_s12, 5  ;;  %p2418_p9 = scmp.eq.s32.totalorder %s2013_s13, 0 }
  0x11   : > { %s1934_s22 = smov [#allocation2]   ;;  %s1935_s25 = smov [#allocation5]  }
  0x12   : > { %p2041_p10 = pnand %p1355_p7, %p249_p8  ;;  %s261_s23 = sshll.u32 %s1934_s22, 4  ;;  %s262_s23 = int_to_ptr.vmem [resolvable:$true] %s261_s23 }
  0x13   : > { %s277_s26 = sshll.u32 %s1935_s25, 4  ;;  %s1806_s29 = scalar_lea.hbm %s2409_s1, 8192  ;;  %s2053_s26 = int_to_ptr.vmem [resolvable:$true] %s277_s26 }
  0x14   : > { %s2429_s21 = scalar_select %p2041_p10, 1, 0 }
  0x15   : > { %p1735_p11 = pneg %p2041_p10  ;;  %p1807_p13 = scmp.ne.s32.totalorder %s2409_s1, %s1806_s29 }
  0x16   : > { %p1813_p3 = scmp.lt.u32.totalorder %s1806_s29, %s2409_s1 }
  0x17   : > { %p2049_p12 = pnand %p2418_p9, %p1735_p11 }
  0x19   : > { %p1808_p0 = pneg %p2049_p12 }
  0x1b   : > { %p1809_p1 = pnand %p1808_p0, %p1807_p13 }
  0x1d   : > { %p1810_p2 = pneg %p1809_p1 }
  0x1f   : > { %p1815_p4 = pnand %p1813_p3, %p1810_p2 }
  0x21   : > { %1818 = shalt.err (!%p1815_p4)
}
  0x22   : > { %s1819_s25 = scalar_lea.vmem %s262_s23, 8192  ;;  %p1827_p9 = scmp.lt.s32.totalorder %s262_s23, %s262_s23 }
  0x23   : > { %p1820_p7 = scmp.ne.s32.totalorder %s262_s23, %s1819_s25  ;;  %p1828_p6 = scmp.lt.s32.totalorder %s1819_s25, %s1819_s25 }
  0x25   : > { %p1822_p8 = pnand %p1820_p7, %p1808_p0  ;;  %p1829_p5 = por %p1828_p6, %p1827_p9 }
  0x27   : > { %p1823_p11 = pneg %p1822_p8 }
  0x29   : > { %p1830_p10 = pnand %p1829_p5, %p1823_p11 }
  0x2b   : > { %1833 = shalt.err (!%p1830_p10)
}
  0x2c   : > { %s1936_s27 = smov 256   ;;  %s1937_s28 = smov 16  }
  0x2d   : > { %1738 = dma.hbm_to_vmem [thread:$0]  (!%p2049_p12), %s2409_s1, 8192, %s262_s23, [#allocation3], %s1936_s27, %s1936_s27, %s1937_s28  }
  0x2e   : > { %s1834_s22 = scalar_lea.hbm %s2411_s3, 8192 }
  0x2f   : > { %p1835_p13 = scmp.ne.s32.totalorder %s2411_s3, %s1834_s22  ;;  %p1841_p9 = scmp.lt.u32.totalorder %s1834_s22, %s2411_s3 }
  0x31   : > { %p1837_p5 = pnand %p1835_p13, %p1808_p0 }
  0x33   : > { %p1838_p6 = pneg %p1837_p5 }
  0x35   : > { %p1843_p10 = pnand %p1841_p9, %p1838_p6 }
  0x37   : > { %1846 = shalt.err (!%p1843_p10)
}
  0x38   : > { %s1847_s23 = scalar_lea.vmem %s2053_s26, 8192  ;;  %p1855_p4 = scmp.lt.s32.totalorder %s2053_s26, %s2053_s26 }
  0x39   : > { %p1848_p1 = scmp.ne.s32.totalorder %s2053_s26, %s1847_s23  ;;  %p1856_p7 = scmp.lt.s32.totalorder %s1847_s23, %s1847_s23 }
  0x3b   : > { %p1850_p2 = pnand %p1848_p1, %p1808_p0  ;;  %p1857_p8 = por %p1856_p7, %p1855_p4 }
  0x3d   : > { %p1851_p3 = pneg %p1850_p2 }
  0x3f   : > { %p1858_p11 = pnand %p1857_p8, %p1851_p3 }
  0x41   : > { %1861 = shalt.err (!%p1858_p11)
}
  0x42   : > { %1741 = dma.hbm_to_vmem [thread:$0]  (!%p2049_p12), %s2411_s3, 8192, %s2053_s26, [#allocation6], %s1936_s27, %s1936_s27, %s1937_s28  }
  0x43   : > { %p2431_p13 = scmp.ne.s32.totalorder %s2429_s21, 0 }
  0x44   : > { %p2432_p5 = scmp.eq.s32.totalorder (!%p2431_p13), %s2013_s13, 0 }
  0x45   : > { %318 = sbr.rel (%p2431_p13) target bundleno = 1553 (0x611), region = 56 }
  0x4c   : > { %1907 = dma.done.wait (%p2432_p5), [#allocation3], 8192   ;;  %p2433_p0 = pmov %p2432_p5 }
  0x4e   : > { %1909 = vsyncadd (%p2433_p0), [#allocation3], 4294959104  ;;  %p2434_p6 = pmov %p2433_p0 }
  0x4f   : > { %p2435_p9 = pmov %p2433_p0 }
  0x50   : > { %1911 = dma.done.wait (%p2434_p6), [#allocation6], 8192  }
  0x51   : > { %1913 = vsyncadd (%p2435_p9), [#allocation6], 4294959104  ;;  %v372_v0 = vld [vmem:[#allocation2 + $0x8] sm:$0xff]  ;;  %v374_v1 = vld [vmem:[#allocation2 + $0x18] sm:$0xff]  ;;  %s1363_s18 = sshll.u32 %s2013_s13, 1  ;;  %vm724_vm0 = vcmask 64512  }
  0x52   : > { %v371_v2 = vld [vmem:[#allocation2] sm:$0xff]  ;;  %v1501_v3 = vpack.c.bf16 %v374_v1, %v372_v0  ;;  %v373_v4 = vld [vmem:[#allocation2 + $0x10] sm:$0xff]  ;;  %v376_v5 = vld [vmem:[#allocation2 + $0x28] sm:$0xff]  ;;  %p360_p12 = scmp.lt.s32.totalorder %s1363_s18, 7  ;;  %s356_s22 = sand.u32 1, %s1924_s10  }
  0x53   : > { %v378_v6 = vld [vmem:[#allocation2 + $0x38] sm:$0xff]  ;;  %v1503_v7 = vpack.c.bf16 %v373_v4, %v371_v2  ;;  %v375_v9 = vld [vmem:[#allocation2 + $0x20] sm:$0xff]  ;;  %v377_v10 = vld [vmem:[#allocation2 + $0x30] sm:$0xff]  ;;  %s1362_s25 = sshll.u32 %s356_s22, 4  ;;  %s1378_s11 = sshll.u32 %s2013_s13, 8 }
  0x54   : > { %v1505_v8 = vpack.c.bf16 %v378_v6, %v376_v5  ;;  %v380_v11 = vld [vmem:[#allocation2 + $0x48] sm:$0xff]  ;;  %1502 = vmatprep.subr.bf16.mxu0 %v1501_v3  ;;  %v382_v12 = vld [vmem:[#allocation2 + $0x58] sm:$0xff]  ;;  %v1507_v13 = vpack.c.bf16 %v377_v10, %v375_v9  ;;  %v379_v15 = vld [vmem:[#allocation2 + $0x40] sm:$0xff]  ;;  %s2444_s18 = smov (!%p360_p12, %s1363_s18), 7  ;;  %s358_s23 = scalar_lea.vmem [#allocation7], %s1362_s25 }
  0x55   : > { %1504 = vmatpush1.bf16.msra.mxu0 %v1503_v7  ;;  %v1509_v14 = vpack.c.bf16 %v382_v12, %v380_v11  ;;  %v381_v16 = vld [vmem:[#allocation2 + $0x50] sm:$0xff]  ;;  %v384_v17 = vld [vmem:[#allocation2 + $0x68] sm:$0xff]  ;;  %v386_v18 = vld [vmem:[#allocation2 + $0x78] sm:$0xff]  ;;  %s1377_s21 = sshll.u32 %s2444_s18, 4  ;;  %s2367_s13 = scalar_lea.sflag [#allocation4], %s356_s22 }
  0x56   : > { %1506 = vmatprep.subr.bf16.mxu0 %v1505_v8  ;;  %v1511_v19 = vpack.c.bf16 %v381_v16, %v379_v15  ;;  %v1513_v20 = vpack.c.bf16 %v386_v18, %v384_v17  ;;  %v383_v21 = vld [vmem:[#allocation2 + $0x60] sm:$0xff]  ;;  %v385_v22 = vld [vmem:[#allocation2 + $0x70] sm:$0xff]  ;;  %v388_v23 = vld [vmem:[#allocation2 + $0x88] sm:$0xff]  ;;  %s2116_s27 = scalar_lea.vmem %s2408_s0, %s1377_s21  ;;  %s2365_s21 = scalar_lea.hbm %s2417_s9, %s1378_s11 }
  0x57   : > { %v390_v24 = vld [vmem:[#allocation2 + $0x98] sm:$0xff]  ;;  %v1515_v25 = vpack.c.bf16 %v385_v22, %v383_v21  ;;  %v387_v27 = vld [vmem:[#allocation2 + $0x80] sm:$0xff]  ;;  %v389_v28 = vld [vmem:[#allocation2 + $0x90] sm:$0xff]  ;;  %p2436_p1 = scmp.ne.s32.totalorder %s2427_s19, 0  ;;  %s1939_s26 = smov [#allocation7]  }
  0x58   : > { %v1517_v26 = vpack.c.bf16 %v390_v24, %v388_v23  ;;  %v392_v29 = vld [vmem:[#allocation2 + $0xa8] sm:$0xff]  ;;  %v394_v30 = vld [vmem:[#allocation2 + $0xb8] sm:$0xff]  ;;  %v1519_v31 = vpack.c.bf16 %v389_v28, %v387_v27  ;;  %v391_v33 = vld [vmem:[#allocation2 + $0xa0] sm:$0xff]  ;;  %s1866_s28 = sshll.u32 %s1939_s26, 4  ;;  %s1867_s28 = int_to_ptr.vmem [resolvable:$false] %s1866_s28 }
  0x59   : > { %1508 = vmatpush1.bf16.msra.mxu0 %v1507_v13  ;;  %v1521_v32 = vpack.c.bf16 %v394_v30, %v392_v29  ;;  %v393_v34 = vld [vmem:[#allocation2 + $0xb0] sm:$0xff]  ;;  %v396_v35 = vld [vmem:[#allocation2 + $0xc8] sm:$0xff]  ;;  %v398_v36 = vld [vmem:[#allocation2 + $0xd8] sm:$0xff]  ;;  %s1868_s29 = scalar_lea.vmem %s1867_s28, 512 }
  0x5a   : > { %1510 = vmatprep.subr.bf16.mxu0 %v1509_v14  ;;  %v1523_v37 = vpack.c.bf16 %v393_v34, %v391_v33  ;;  %v1525_v38 = vpack.c.bf16 %v398_v36, %v396_v35  ;;  %v395_v39 = vld [vmem:[#allocation2 + $0xc0] sm:$0xff]  ;;  %v397_v40 = vld [vmem:[#allocation2 + $0xd0] sm:$0xff]  ;;  %v368_v41 = vld [vmem:[%s2116_s27 + $0x8] sm:$0xff] }
  0x5b   : > { %v400_v42 = vld [vmem:[#allocation2 + $0xe8] sm:$0xff]  ;;  %v402_v43 = vld [vmem:[#allocation2 + $0xf8] sm:$0xff]  ;;  %511 = vmatprep.mubr.f32.mxu0 %v368_v41  ;;  %v540_v44 = vld [vmem:[%s2414_s6 + $0x80] sm:$0xff]  ;;  %v1527_v50 = vpack.c.bf16 %v397_v40, %v395_v39 }
  0x5c   : > { %v399_v45 = vld [vmem:[#allocation2 + $0xe0] sm:$0xff]  ;;  %v401_v46 = vld [vmem:[#allocation2 + $0xf0] sm:$0xff]  ;;  %v541_v47 = vld [vmem:[%s2414_s6 + $0x88] sm:$0xff]  ;;  %v1529_v56 = vpack.c.bf16 %v402_v43, %v400_v42 }
  0x5d   : > { %1512 = vmatpush1.bf16.msra.mxu0 %v1511_v19  ;;  %v524_v48 = vld [vmem:[%s2414_s6] sm:$0xff]  ;;  %v525_v49 = vld [vmem:[%s2414_s6 + $0x8] sm:$0xff]  ;;  %v2131_v51 = vpack.c.bf16 %v541_v47, %v540_v44  ;;  %v542_v53 = vld [vmem:[%s2414_s6 + $0x90] sm:$0xff]  ;;  %v1531_v0 = vpack.c.bf16 %v401_v46, %v399_v45 }
  0x5e   : > { %1514 = vmatprep.subr.bf16.mxu0 %v1513_v20  ;;  %v2133_v52 = vpack.c.bf16 %v525_v49, %v524_v48  ;;  %v543_v54 = vld [vmem:[%s2414_s6 + $0x98] sm:$0xff]  ;;  %v526_v55 = vld [vmem:[%s2414_s6 + $0x10] sm:$0xff]  ;;  %v544_v59 = vld [vmem:[%s2414_s6 + $0xa0] sm:$0xff] }
  0x5f   : > { %v2144_v57 = vpack.c.bf16 %v543_v54, %v542_v53  ;;  %v527_v58 = vld [vmem:[%s2414_s6 + $0x18] sm:$0xff]  ;;  %v545_v60 = vld [vmem:[%s2414_s6 + $0xa8] sm:$0xff]  ;;  %1566 = vmatprep.subr.bf16.mxu1 %v2131_v51  ;;  %v403_v1 = vld [vmem:[#allocation2 + $0x100] sm:$0xff] }
  0x60   : > { %v404_v61 = vld [vmem:[#allocation2 + $0x108] sm:$0xff]  ;;  %v406_v62 = vld [vmem:[#allocation2 + $0x118] sm:$0xff]  ;;  %1568 = vmatpush3.bf16.msra.mxu1 %v2133_v52  ;;  %v2157_v63 = vpack.c.bf16 %v527_v58, %v526_v55  ;;  %v2160_v2 = vpack.c.bf16 %v545_v60, %v544_v59  ;;  %v528_v3 = vld [vmem:[%s2414_s6 + $0x20] sm:$0xff] }
  0x61   : > { %1516 = vmatpush1.bf16.msra.mxu0 %v1515_v25  ;;  %1570 = vmatprep.subr.bf16.mxu1 %v2144_v57  ;;  %v529_v4 = vld [vmem:[%s2414_s6 + $0x28] sm:$0xff]  ;;  %v1533_v5 = vpack.c.bf16 %v406_v62, %v404_v61  ;;  %v405_v6 = vld [vmem:[#allocation2 + $0x110] sm:$0xff]  ;;  %v547_v8 = vld [vmem:[%s2414_s6 + $0xb8] sm:$0xff] }
  0x62   : > { %1518 = vmatprep.subr.bf16.mxu0 %v1517_v26  ;;  %v546_v7 = vld [vmem:[%s2414_s6 + $0xb0] sm:$0xff]  ;;  %v408_v9 = vld [vmem:[#allocation2 + $0x128] sm:$0xff]  ;;  %v410_v10 = vld [vmem:[#allocation2 + $0x138] sm:$0xff]  ;;  %v2175_v11 = vpack.c.bf16 %v529_v4, %v528_v3  ;;  %v1535_v12 = vpack.c.bf16 %v405_v6, %v403_v1 }
  0x63   : > { %v407_v13 = vld [vmem:[#allocation2 + $0x120] sm:$0xff]  ;;  %v2178_v14 = vpack.c.bf16 %v547_v8, %v546_v7  ;;  %v530_v15 = vld [vmem:[%s2414_s6 + $0x30] sm:$0xff]  ;;  %v531_v16 = vld [vmem:[%s2414_s6 + $0x38] sm:$0xff]  ;;  %v1537_v17 = vpack.c.bf16 %v410_v10, %v408_v9 }
  0x64   : > { %1572 = vmatpush3.bf16.msra.mxu1 %v2157_v63  ;;  %v409_v18 = vld [vmem:[#allocation2 + $0x130] sm:$0xff]  ;;  %v548_v19 = vld [vmem:[%s2414_s6 + $0xc0] sm:$0xff]  ;;  %v549_v20 = vld [vmem:[%s2414_s6 + $0xc8] sm:$0xff]  ;;  %v2193_v23 = vpack.c.bf16 %v531_v16, %v530_v15 }
  0x65   : > { %1520 = vmatpush1.bf16.msra.mxu0 %v1519_v31  ;;  %1574 = vmatprep.subr.bf16.mxu1 %v2160_v2  ;;  %v412_v21 = vld [vmem:[#allocation2 + $0x148] sm:$0xff]  ;;  %v414_v22 = vld [vmem:[#allocation2 + $0x158] sm:$0xff]  ;;  %v1539_v24 = vpack.c.bf16 %v409_v18, %v407_v13  ;;  %v411_v25 = vld [vmem:[#allocation2 + $0x140] sm:$0xff]  ;;  %v2196_v26 = vpack.c.bf16 %v549_v20, %v548_v19 }
  0x66   : > { %1522 = vmatprep.subr.bf16.mxu0 %v1521_v32  ;;  %v532_v27 = vld [vmem:[%s2414_s6 + $0x40] sm:$0xff]  ;;  %v533_v28 = vld [vmem:[%s2414_s6 + $0x48] sm:$0xff]  ;;  %v1541_v29 = vpack.c.bf16 %v414_v22, %v412_v21  ;;  %v413_v30 = vld [vmem:[#allocation2 + $0x150] sm:$0xff] }
  0x67   : > { %v550_v31 = vld [vmem:[%s2414_s6 + $0xd0] sm:$0xff]  ;;  %v551_v32 = vld [vmem:[%s2414_s6 + $0xd8] sm:$0xff]  ;;  %v416_v33 = vld [vmem:[#allocation2 + $0x168] sm:$0xff]  ;;  %v2211_v35 = vpack.c.bf16 %v533_v28, %v532_v27  ;;  %v1543_v36 = vpack.c.bf16 %v413_v30, %v411_v25 }
  0x68   : > { %1576 = vmatpush3.bf16.msra.mxu1 %v2175_v11  ;;  %v418_v34 = vld [vmem:[#allocation2 + $0x178] sm:$0xff]  ;;  %v534_v39 = vld [vmem:[%s2414_s6 + $0x50] sm:$0xff]  ;;  %v552_v43 = vld [vmem:[%s2414_s6 + $0xe0] sm:$0xff] }
  0x69   : > { %1524 = vmatpush1.bf16.msra.mxu0 %v1523_v37  ;;  %1578 = vmatprep.subr.bf16.mxu1 %v2178_v14  ;;  %v415_v37 = vld [vmem:[#allocation2 + $0x160] sm:$0xff]  ;;  %v535_v40 = vld [vmem:[%s2414_s6 + $0x58] sm:$0xff]  ;;  %v1545_v41 = vpack.c.bf16 %v418_v34, %v416_v33  ;;  %v417_v42 = vld [vmem:[#allocation2 + $0x170] sm:$0xff] }
  0x6a   : > { %1526 = vmatprep.subr.bf16.mxu0 %v1525_v38  ;;  %v2214_v38 = vpack.c.bf16 %v551_v32, %v550_v31  ;;  %v553_v44 = vld [vmem:[%s2414_s6 + $0xe8] sm:$0xff]  ;;  %v422_v46 = vld [vmem:[#allocation2 + $0x198] sm:$0xff]  ;;  %v2229_v47 = vpack.c.bf16 %v535_v40, %v534_v39  ;;  %v1547_v48 = vpack.c.bf16 %v417_v42, %v415_v37  ;;  %v419_v55 = vld [vmem:[#allocation2 + $0x180] sm:$0xff] }
  0x6b   : > { %v420_v45 = vld [vmem:[#allocation2 + $0x188] sm:$0xff]  ;;  %v2232_v49 = vpack.c.bf16 %v553_v44, %v552_v43  ;;  %v426_v59 = vld [vmem:[#allocation2 + $0x1b8] sm:$0xff]  ;;  %v425_v1 = vld [vmem:[#allocation2 + $0x1b0] sm:$0xff] }
  0x6c   : > { %1580 = vmatpush3.bf16.msra.mxu1 %v2193_v23  ;;  %v537_v53 = vld [vmem:[%s2414_s6 + $0x68] sm:$0xff]  ;;  %v1549_v54 = vpack.c.bf16 %v422_v46, %v420_v45  ;;  %v430_v4 = vld [vmem:[#allocation2 + $0x1d8] sm:$0xff]  ;;  %v427_v7 = vld [vmem:[#allocation2 + $0x1c0] sm:$0xff] }
  0x6d   : > { %1528 = vmatpush1.bf16.msra.mxu0 %v1527_v50  ;;  %1582 = vmatprep.subr.bf16.mxu1 %v2196_v26  ;;  %v536_v50 = vld [vmem:[%s2414_s6 + $0x60] sm:$0xff]  ;;  %v424_v58 = vld [vmem:[#allocation2 + $0x1a8] sm:$0xff]  ;;  %v429_v8 = vld [vmem:[#allocation2 + $0x1d0] sm:$0xff] }
  0x6e   : > { %1530 = vmatprep.subr.bf16.mxu0 %v1529_v56  ;;  %v421_v56 = vld [vmem:[#allocation2 + $0x190] sm:$0xff]  ;;  %v2241_v60 = vpack.c.bf16 %v537_v53, %v536_v50  ;;  %v1553_v62 = vpack.c.bf16 %v426_v59, %v424_v58  ;;  %v428_v3 = vld [vmem:[#allocation2 + $0x1c8] sm:$0xff]  ;;  %v434_v10 = vld [vmem:[#allocation2 + $0x1f8] sm:$0xff] }
  0x6f   : > { %v1551_v61 = vpack.c.bf16 %v421_v56, %v419_v55  ;;  %v1557_v6 = vpack.c.bf16 %v430_v4, %v428_v3  ;;  %v432_v9 = vld [vmem:[#allocation2 + $0x1e8] sm:$0xff]  ;;  %v431_v15 = vld [vmem:[#allocation2 + $0x1e0] sm:$0xff]  ;;  %v433_v16 = vld [vmem:[#allocation2 + $0x1f0] sm:$0xff]  ;;  %v1938_v56 = vmov 0.0  }
  0x70   : > { %1584 = vmatpush3.bf16.msra.mxu1 %v2211_v35  ;;  %v1561_v13 = vpack.c.bf16 %v434_v10, %v432_v9  ;;  %v367_v18 = vld [vmem:[%s2116_s27] sm:$0xff]  ;;  %v370_v19 = vld [vmem:[%s2116_s27 + $0x18] sm:$0xff]  ;;  %v369_v20 = vld [vmem:[%s2116_s27 + $0x10] sm:$0xff]  ;;  %s1270_s27 = sshll.u32 %s358_s23, 4  ;;  %s2360_s27 = int_to_ptr.vmem [resolvable:$true] %s1270_s27 }
  0x71   : > { %1532 = vmatpush1.bf16.msra.mxu0 %v1531_v0  ;;  %1586 = vmatprep.subr.bf16.mxu1 %v2214_v38  ;;  %v423_v0 = vld [vmem:[#allocation2 + $0x1a0] sm:$0xff]  ;;  %v554_v21 = vld [vmem:[%s2414_s6 + $0xf0] sm:$0xff]  ;;  %v555_v22 = vld [vmem:[%s2414_s6 + $0xf8] sm:$0xff]  ;;  %s1862_s24 = scalar_lea.vmem %s2360_s27, 256  ;;  %p1869_p4 = scmp.lt.s32.totalorder %s2360_s27, %s1867_s28 }
  0x72   : > { %1534 = vmatprep.subr.bf16.mxu0 %v1533_v5  ;;  %v1555_v5 = vpack.c.bf16 %v425_v1, %v423_v0  ;;  %v538_v25 = vld [vmem:[%s2414_s6 + $0x70] sm:$0xff]  ;;  %v539_v27 = vld [vmem:[%s2414_s6 + $0x78] sm:$0xff]  ;;  %v435_v32 = vld [vmem:[%s2410_s2] sm:$0x3]  ;;  %p1863_p10 = scmp.ne.s32.totalorder %s2360_s27, %s1862_s24  ;;  %p1870_p7 = scmp.lt.s32.totalorder %s1868_s29, %s1862_s24 }
  0x73   : > { %v2262_v28 = vpack.c.bf16 %v539_v27, %v538_v25  ;;  %v722_v55 = vld [vmem:[%s2415_s7] sm:$0xff]  ;;  %v904_v58 = vld [vmem:[#allocation5 + $0x8] sm:$0xff]  ;;  %v906_v59 = vld [vmem:[#allocation5 + $0x18] sm:$0xff] }
  0x74   : > { %1588 = vmatpush3.bf16.msra.mxu1 %v2229_v47  ;;  %v905_v0 = vld [vmem:[#allocation5 + $0x10] sm:$0xff]  ;;  %v908_v1 = vld [vmem:[#allocation5 + $0x28] sm:$0xff]  ;;  %v910_v3 = vld [vmem:[#allocation5 + $0x38] sm:$0xff]  ;;  %p1864_p2 = pnand %p1863_p10, %p2436_p1  ;;  %p1871_p8 = por %p1870_p7, %p1869_p4 }
  0x75   : > { %1536 = vmatpush1.bf16.msra.mxu0 %v1535_v12  ;;  %1590 = vmatprep.subr.bf16.mxu1 %v2232_v49  ;;  %v1559_v12 = vpack.c.bf16 %v429_v8, %v427_v7  ;;  %v909_v7 = vld [vmem:[#allocation5 + $0x30] sm:$0xff]  ;;  %v912_v8 = vld [vmem:[#allocation5 + $0x48] sm:$0xff]  ;;  %v914_v9 = vld [vmem:[#allocation5 + $0x58] sm:$0xff] }
  0x76   : > { %1538 = vmatprep.subr.bf16.mxu0 %v1537_v17  ;;  %v1563_v17 = vpack.c.bf16 %v433_v16, %v431_v15  ;;  %v913_v15 = vld [vmem:[#allocation5 + $0x50] sm:$0xff]  ;;  %p1865_p3 = pneg %p1864_p2 }
  0x78   : > { %1592 = vmatpush3.bf16.msra.mxu1 %v2241_v60  ;;  %p1872_p11 = pnand %p1871_p8, %p1865_p3 }
  0x79   : > { %1540 = vmatpush1.bf16.msra.mxu0 %v1539_v24  ;;  %v2254_v24 = vpack.c.bf16 %v555_v22, %v554_v21 }
  0x7a   : > { %1542 = vmatprep.subr.bf16.mxu0 %v1541_v29  ;;  %v437_v29 = vlaneseq }
  0x7b   : > { %1594 = vmatprep.subr.bf16.mxu1 %v2254_v24 }
  0x7c   : > { %1596 = vmatpush3.bf16.msra.mxu1 %v2262_v28  ;;  %v438_v30 = vshrl.u32 %v437_v29, 7 }
  0x7d   : > { %1544 = vmatpush1.bf16.msra.mxu0 %v1543_v36  ;;  %1598 = vmatprep.subr.bf16.mxu1 %v2131_v51 }
  0x7e   : > { %1546 = vmatprep.subr.bf16.mxu0 %v1545_v41  ;;  %v2268_v31 = vsub.s32 1, %v438_v30  ;;  %v2273_v33 = vsub.s32 0, %v438_v30 }
  0x80   : > { %v444_v34 = vrot.slane %v435_v32, %v2268_v31  ;;  %v440_v36 = vrot.slane %v435_v32, %v2273_v33 }
  0x81   : > { %1548 = vmatpush1.bf16.msra.mxu0 %v1547_v48 }
  0x82   : > { %1550 = vmatprep.subr.bf16.mxu0 %v1549_v54  ;;  %v723_v54 = vld [vmem:[%s2415_s7 + $0x8] sm:$0xff] }
  0x85   : > { %1552 = vmatpush1.bf16.msra.mxu0 %v1551_v61  ;;  %v903_v61 = vld [vmem:[#allocation5] sm:$0xff] }
  0x86   : > { %1554 = vmatprep.subr.bf16.mxu0 %v1553_v62  ;;  %v1629_v62 = vpack.c.bf16 %v906_v59, %v904_v58  ;;  %v1631_v4 = vpack.c.bf16 %v905_v0, %v903_v61  ;;  %v925_v59 = vld [vmem:[#allocation5 + $0xb0] sm:$0xff]  ;;  %v928_v61 = vld [vmem:[#allocation5 + $0xc8] sm:$0xff] }
  0x89   : > { %1556 = vmatpush1.bf16.msra.mxu0 %v1555_v5  ;;  %v1633_v5 = vpack.c.bf16 %v910_v3, %v908_v1  ;;  %v927_v3 = vld [vmem:[#allocation5 + $0xc0] sm:$0xff] }
  0x8a   : > { %1558 = vmatprep.subr.bf16.mxu0 %v1557_v6  ;;  %v907_v6 = vld [vmem:[#allocation5 + $0x20] sm:$0xff] }
  0x8b   : > { %v1635_v10 = vpack.c.bf16 %v909_v7, %v907_v6  ;;  %v934_v6 = vld [vmem:[#allocation5 + $0xf8] sm:$0xff] }
  0x8d   : > { %1560 = vmatpush1.bf16.msra.mxu0 %v1559_v12  ;;  %v1637_v12 = vpack.c.bf16 %v914_v9, %v912_v8  ;;  %v931_v9 = vld [vmem:[#allocation5 + $0xe0] sm:$0xff] }
  0x8e   : > { %1562 = vmatprep.subr.bf16.mxu0 %v1561_v13  ;;  %v911_v13 = vld [vmem:[#allocation5 + $0x40] sm:$0xff] }
  0x8f   : > { %v1639_v16 = vpack.c.bf16 %v913_v15, %v911_v13  ;;  %v938_v13 = vld [vmem:[#allocation5 + $0x118] sm:$0xff] }
  0x91   : > { %1564 = vmatpush1.bf16.msra.mxu0 %v1563_v17 }
  0x92   : > { %1630 = vmatprep.subr.bf16.mxu0 %v1629_v62  ;;  %v930_v62 = vld [vmem:[#allocation5 + $0xd8] sm:$0xff] }
  0x93   : > { %v1653_v1 = vpack.c.bf16 %v930_v62, %v928_v61  ;;  %v963_v62 = vld [vmem:[#allocation5 + $0x1e0] sm:$0xff] }
  0x94   : > { %512 = vmatmul.mubr.f32.vlgmr.msra.gmra.mrb[0].mxu0 %v367_v18 }
  0x95   : > { %517 = vmatprep.mubr.f32.mxu0 %v370_v19  ;;  %1632 = vmatpush1.bf16.msra.mxu0 %v1631_v4  ;;  %v929_v4 = vld [vmem:[#allocation5 + $0xd0] sm:$0xff] }
  0x96   : > { %1634 = vmatprep.subr.bf16.mxu0 %v1633_v5  ;;  %v932_v5 = vld [vmem:[#allocation5 + $0xe8] sm:$0xff]  ;;  %v1655_v7 = vpack.c.bf16 %v929_v4, %v927_v3 }
  0x97   : > { %v1657_v8 = vpack.c.bf16 %v934_v6, %v932_v5 }
  0x98   : > { %518 = vmatmul.mubr.f32.gmra.mrb[2].mxu0 %v369_v20 }
  0x99   : > { %1636 = vmatpush1.bf16.msra.mxu0 %v1635_v10  ;;  %v933_v10 = vld [vmem:[#allocation5 + $0xf0] sm:$0xff] }
  0x9a   : > { %1638 = vmatprep.subr.bf16.mxu0 %v1637_v12  ;;  %v936_v12 = vld [vmem:[#allocation5 + $0x108] sm:$0xff]  ;;  %v1659_v15 = vpack.c.bf16 %v933_v10, %v931_v9 }
  0x9d   : > { %1640 = vmatpush1.bf16.msra.mxu0 %v1639_v16  ;;  %v1661_v16 = vpack.c.bf16 %v938_v13, %v936_v12 }
 0x167   : > { %v513_v37 = vpop.f32.mrb[0].mxu0 }
 0x168   : > { %v515_v39 = vpop.f32.mrb[1].mxu0  ;;  %v2279_v41 = vadd.f32 %v513_v37, %v440_v36 }
 0x169   : > { %v2277_v40 = vadd.f32 %v515_v39, %v444_v34 }
 0x16a   : > { %v631_v48 = vmul.f32 %v2279_v41, %v2279_v41 }
 0x16b   : > { %v519_v42 = vpop.f32.mrb[2].mxu0  ;;  %620 = vmatprep.mubr.f32.mxu1 %v2277_v40  ;;  %v632_v46 = vmul.f32 %v2277_v40, %v2277_v40 }
 0x16c   : > { %v2282_v43 = vadd.f32 %v519_v42, %v440_v36  ;;  %v521_v44 = vpop.f32.mrb[3].mxu0  ;;  %621 = vmatmul.mubr.f32.vlgmr.msra.gmra.mrb[0].mxu1 %v2279_v41 }
 0x16d   : > { %v2285_v45 = vadd.f32 %v521_v44, %v444_v34  ;;  %1600 = vmatpush3.bf16.msra.mxu1 %v2133_v52 }
 0x16e   : > { %1602 = vmatprep.subr.bf16.mxu1 %v2144_v57  ;;  %v633_v53 = vmul.f32 %v2282_v43, %v2282_v43 }
 0x16f   : > { %625 = vmatprep.mubr.f32.mxu1 %v2285_v45  ;;  %v634_v50 = vmul.f32 %v2285_v45, %v2285_v45 }
 0x170   : > { %626 = vmatmul.mubr.f32.gmra.mrb[2].mxu1 %v2282_v43 }
 0x171   : > { %1604 = vmatpush3.bf16.msra.mxu1 %v2157_v63  ;;  %699 = vmatprep.mubr.f32.mxu1 %v632_v46 }
 0x172   : > { %1606 = vmatprep.subr.bf16.mxu1 %v2160_v2 }
 0x175   : > { %1608 = vmatpush3.bf16.msra.mxu1 %v2175_v11 }
 0x176   : > { %1610 = vmatprep.subr.bf16.mxu1 %v2178_v14 }
 0x179   : > { %1612 = vmatpush3.bf16.msra.mxu1 %v2193_v23 }
 0x17a   : > { %1614 = vmatprep.subr.bf16.mxu1 %v2196_v26 }
 0x17d   : > { %1616 = vmatpush3.bf16.msra.mxu1 %v2211_v35 }
 0x17e   : > { %1618 = vmatprep.subr.bf16.mxu1 %v2214_v38 }
 0x181   : > { %1620 = vmatpush3.bf16.msra.mxu1 %v2229_v47 }
 0x182   : > { %1622 = vmatprep.subr.bf16.mxu1 %v2232_v49 }
 0x185   : > { %1624 = vmatpush3.bf16.msra.mxu1 %v2241_v60 }
 0x186   : > { %1626 = vmatprep.subr.bf16.mxu1 %v2254_v24 }
 0x189   : > { %1628 = vmatpush3.bf16.msra.mxu1 %v2262_v28 }
 0x18a   : > { %731 = vmatprep.subr.mxu1 %v723_v54 }
 0x18c   : > { %700 = vmatmul.mubr.f32.vlgmr.msra.gmra.mrb[4].mxu1 %v631_v48 }
 0x18d   : > { %704 = vmatprep.mubr.f32.mxu1 %v634_v50  ;;  %732 = vmatpush1.msra.mxu1 %v722_v55 }
 0x18e   : > { %814 = vmatprep.subr.mxu1 %v723_v54 }
 0x190   : > { %705 = vmatmul.mubr.f32.gmra.mrb[6].mxu1 %v633_v53 }
 0x191   : > { %795 = vmatprep.mubr.f32.mxu1 %v1938_v56 }
 0x23f   : > { %v1411_v17 = vpop.f32.mrb[0].mxu1 }
 0x240   : > { %v1412_v18 = vpop.f32.mrb[1].mxu1 }
 0x241   : > { %v1413_v19 = vadd.f32 %v1412_v18, %v1411_v17  ;;  %v935_v17 = vld [vmem:[#allocation5 + $0x100] sm:$0xff]  ;;  %v937_v18 = vld [vmem:[#allocation5 + $0x110] sm:$0xff] }
 0x243   : > { %v710_v20 = vmul.f32 0.02, %v1413_v19  ;;  %v1414_v21 = vpop.f32.mrb[2].mxu1  ;;  %v940_v19 = vld [vmem:[#allocation5 + $0x128] sm:$0xff] }
 0x244   : > { %v1415_v22 = vpop.f32.mrb[3].mxu1 }
 0x245   : > { %v1416_v25 = vadd.f32 %v1415_v22, %v1414_v21  ;;  %1366 = vmatmul.mubr.msk.f32.vlgmr.msra.gmra.mrb[8].mxu1 %vm724_vm0, %v710_v20  ;;  %v714_v36 = vmul.f32 %v710_v20, %v710_v20  ;;  %v942_v20 = vld [vmem:[#allocation5 + $0x138] sm:$0xff]  ;;  %v1663_v21 = vpack.c.bf16 %v937_v18, %v935_v17 }
 0x246   : > { %801 = vmatprep.mubr.f32.mxu1 %v1938_v56  ;;  %815 = vmatpush1.msra.mxu1 %v722_v55  ;;  %v1665_v22 = vpack.c.bf16 %v942_v20, %v940_v19 }
 0x247   : > { %v711_v27 = vmul.f32 0.02, %v1416_v25  ;;  %1694 = vmatprep.subr.bf16.mxu1 %v2131_v51  ;;  %v939_v25 = vld [vmem:[#allocation5 + $0x120] sm:$0xff] }
 0x249   : > { %1367 = vmatmul.mubr.msk.f32.gmra.mrb[10].mxu1 %vm724_vm0, %v711_v27  ;;  %v715_v48 = vmul.f32 %v711_v27, %v711_v27  ;;  %v941_v27 = vld [vmem:[#allocation5 + $0x130] sm:$0xff] }
 0x24a   : > { %878 = vmatprep.mubr.f32.mxu1 %v1938_v56 }
 0x25f   : > { %v1449_v30 = vpop.f32.mrb[4].mxu1 }
 0x260   : > { %v1450_v32 = vpop.f32.mrb[5].mxu1 }
 0x261   : > { %v1451_v34 = vadd.f32 %v1450_v32, %v1449_v30  ;;  %v944_v30 = vld [vmem:[#allocation5 + $0x148] sm:$0xff]  ;;  %v946_v32 = vld [vmem:[#allocation5 + $0x158] sm:$0xff] }
 0x263   : > { %v712_v37 = vmul.f32 0.02, %v1451_v34  ;;  %v1452_v39 = vpop.f32.mrb[6].mxu1  ;;  %v1667_v34 = vpack.c.bf16 %v941_v27, %v939_v25 }
 0x264   : > { %v1453_v42 = vpop.f32.mrb[7].mxu1 }
 0x265   : > { %v716_v44 = vsub.f32 %v712_v37, %v714_v36  ;;  %v1454_v46 = vadd.f32 %v1453_v42, %v1452_v39  ;;  %v1669_v36 = vpack.c.bf16 %v946_v32, %v944_v30  ;;  %v943_v37 = vld [vmem:[#allocation5 + $0x140] sm:$0xff]  ;;  %v945_v39 = vld [vmem:[#allocation5 + $0x150] sm:$0xff]  ;;  %v948_v42 = vld [vmem:[#allocation5 + $0x168] sm:$0xff] }
 0x267   : > { %v718_v50 = vadd.f32 1e-05, %v716_v44  ;;  %v713_v53 = vmul.f32 0.02, %v1454_v46  ;;  %v950_v44 = vld [vmem:[#allocation5 + $0x178] sm:$0xff]  ;;  %v1671_v46 = vpack.c.bf16 %v945_v39, %v943_v37 }
 0x269   : > { %1790 = vrsqrt.f32 %v718_v50  ;;  %v717_v54 = vsub.f32 %v713_v53, %v715_v48  ;;  %v1673_v48 = vpack.c.bf16 %v950_v44, %v948_v42  ;;  %v947_v50 = vld [vmem:[#allocation5 + $0x160] sm:$0xff]  ;;  %v949_v53 = vld [vmem:[#allocation5 + $0x170] sm:$0xff] }
 0x26b   : > { %v719_v55 = vadd.f32 1e-05, %v717_v54  ;;  %v952_v54 = vld [vmem:[#allocation5 + $0x188] sm:$0xff] }
 0x26d   : > { %1792 = vrsqrt.f32 %v719_v55  ;;  %v954_v55 = vld [vmem:[#allocation5 + $0x198] sm:$0xff] }
 0x273   : > { %v1791_v51 = vpop.eup %1790 }
 0x274   : > { %1368 = vmatmul.mubr.msk.f32.vlgmr.msra.gmra.mrb[12].mxu1 %vm724_vm0, %v1791_v51  ;;  %v1675_v51 = vpack.c.bf16 %v949_v53, %v947_v50 }
 0x275   : > { %884 = vmatprep.mubr.f32.mxu1 %v1938_v56  ;;  %1696 = vmatpush3.bf16.msra.mxu1 %v2133_v52  ;;  %v916_v52 = vld [vmem:[#allocation5 + $0x68] sm:$0xff]  ;;  %v926_v56 = vld [vmem:[#allocation5 + $0xb8] sm:$0xff] }
 0x276   : > { %1698 = vmatprep.subr.bf16.mxu1 %v2144_v57  ;;  %v918_v57 = vld [vmem:[#allocation5 + $0x78] sm:$0xff] }
 0x277   : > { %v1793_v58 = vpop.eup %1792 }
 0x278   : > { %1369 = vmatmul.mubr.msk.f32.gmra.mrb[14].mxu1 %vm724_vm0, %v1793_v58  ;;  %v1677_v58 = vpack.c.bf16 %v954_v55, %v952_v54 }
 0x279   : > { %1700 = vmatpush3.bf16.msra.mxu1 %v2157_v63  ;;  %v1641_v63 = vpack.c.bf16 %v918_v57, %v916_v52  ;;  %v951_v52 = vld [vmem:[#allocation5 + $0x180] sm:$0xff]  ;;  %v953_v57 = vld [vmem:[#allocation5 + $0x190] sm:$0xff] }
 0x27a   : > { %1702 = vmatprep.subr.bf16.mxu1 %v2160_v2  ;;  %v915_v2 = vld [vmem:[#allocation5 + $0x60] sm:$0xff] }
 0x27b   : > { %1642 = vmatprep.subr.bf16.mxu0 %v1641_v63  ;;  %v956_v63 = vld [vmem:[#allocation5 + $0x1a8] sm:$0xff] }
 0x27d   : > { %1704 = vmatpush3.bf16.msra.mxu1 %v2175_v11  ;;  %v917_v11 = vld [vmem:[#allocation5 + $0x70] sm:$0xff] }
 0x27e   : > { %1706 = vmatprep.subr.bf16.mxu1 %v2178_v14  ;;  %v1643_v14 = vpack.c.bf16 %v917_v11, %v915_v2  ;;  %v958_v2 = vld [vmem:[#allocation5 + $0x1b8] sm:$0xff]  ;;  %v1679_v11 = vpack.c.bf16 %v953_v57, %v951_v52 }
 0x280   : > { %1644 = vmatpush1.bf16.msra.mxu0 %v1643_v14  ;;  %v1681_v14 = vpack.c.bf16 %v958_v2, %v956_v63 }
 0x281   : > { %1708 = vmatpush3.bf16.msra.mxu1 %v2193_v23  ;;  %v920_v23 = vld [vmem:[#allocation5 + $0x88] sm:$0xff] }
 0x282   : > { %1710 = vmatprep.subr.bf16.mxu1 %v2196_v26  ;;  %v922_v26 = vld [vmem:[#allocation5 + $0x98] sm:$0xff] }
 0x285   : > { %1712 = vmatpush3.bf16.msra.mxu1 %v2211_v35  ;;  %v1645_v35 = vpack.c.bf16 %v922_v26, %v920_v23  ;;  %v955_v23 = vld [vmem:[#allocation5 + $0x1a0] sm:$0xff]  ;;  %v957_v26 = vld [vmem:[#allocation5 + $0x1b0] sm:$0xff] }
 0x286   : > { %1714 = vmatprep.subr.bf16.mxu1 %v2214_v38  ;;  %v919_v38 = vld [vmem:[#allocation5 + $0x80] sm:$0xff] }
 0x287   : > { %1646 = vmatprep.subr.bf16.mxu0 %v1645_v35  ;;  %v960_v35 = vld [vmem:[#allocation5 + $0x1c8] sm:$0xff] }
 0x289   : > { %1716 = vmatpush3.bf16.msra.mxu1 %v2229_v47  ;;  %v921_v47 = vld [vmem:[#allocation5 + $0x90] sm:$0xff] }
 0x28a   : > { %1718 = vmatprep.subr.bf16.mxu1 %v2232_v49  ;;  %v1647_v49 = vpack.c.bf16 %v921_v47, %v919_v38  ;;  %v962_v38 = vld [vmem:[#allocation5 + $0x1d8] sm:$0xff]  ;;  %v1683_v47 = vpack.c.bf16 %v957_v26, %v955_v23 }
 0x28c   : > { %1648 = vmatpush1.bf16.msra.mxu0 %v1647_v49  ;;  %v1685_v49 = vpack.c.bf16 %v962_v38, %v960_v35 }
 0x28d   : > { %1720 = vmatpush3.bf16.msra.mxu1 %v2241_v60  ;;  %v924_v60 = vld [vmem:[#allocation5 + $0xa8] sm:$0xff] }
 0x28e   : > { %1722 = vmatprep.subr.bf16.mxu1 %v2254_v24  ;;  %v923_v24 = vld [vmem:[#allocation5 + $0xa0] sm:$0xff] }
 0x28f   : > { %v1651_v0 = vpack.c.bf16 %v925_v59, %v923_v24  ;;  %v966_v59 = vld [vmem:[#allocation5 + $0x1f8] sm:$0xff] }
 0x291   : > { %1724 = vmatpush3.bf16.msra.mxu1 %v2262_v28  ;;  %v1649_v28 = vpack.c.bf16 %v926_v56, %v924_v60  ;;  %v959_v60 = vld [vmem:[#allocation5 + $0x1c0] sm:$0xff]  ;;  %v961_v56 = vld [vmem:[#allocation5 + $0x1d0] sm:$0xff] }
 0x292   : > { %v1687_v24 = vpack.c.bf16 %v961_v56, %v959_v60 }
 0x293   : > { %1650 = vmatprep.subr.bf16.mxu0 %v1649_v28  ;;  %v964_v28 = vld [vmem:[#allocation5 + $0x1e8] sm:$0xff] }
 0x294   : > { %1652 = vmatpush1.bf16.msra.mxu0 %v1651_v0  ;;  %v1689_v61 = vpack.c.bf16 %v966_v59, %v964_v28  ;;  %v965_v0 = vld [vmem:[#allocation5 + $0x1f0] sm:$0xff] }
 0x295   : > { %1654 = vmatprep.subr.bf16.mxu0 %v1653_v1  ;;  %v1691_v1 = vpack.c.bf16 %v965_v0, %v963_v62 }
 0x298   : > { %1656 = vmatpush1.bf16.msra.mxu0 %v1655_v7 }
 0x299   : > { %1658 = vmatprep.subr.bf16.mxu0 %v1657_v8 }
 0x29c   : > { %1660 = vmatpush1.bf16.msra.mxu0 %v1659_v15 }
 0x29d   : > { %1662 = vmatprep.subr.bf16.mxu0 %v1661_v16 }
 0x2a0   : > { %1664 = vmatpush1.bf16.msra.mxu0 %v1663_v21 }
 0x2a1   : > { %1666 = vmatprep.subr.bf16.mxu0 %v1665_v22 }
 0x2a4   : > { %1668 = vmatpush1.bf16.msra.mxu0 %v1667_v34 }
 0x2a5   : > { %1670 = vmatprep.subr.bf16.mxu0 %v1669_v36 }
 0x2a8   : > { %1672 = vmatpush1.bf16.msra.mxu0 %v1671_v46 }
 0x2a9   : > { %1674 = vmatprep.subr.bf16.mxu0 %v1673_v48 }
 0x2ac   : > { %1676 = vmatpush1.bf16.msra.mxu0 %v1675_v51 }
 0x2ad   : > { %1678 = vmatprep.subr.bf16.mxu0 %v1677_v58 }
 0x2b0   : > { %1680 = vmatpush1.bf16.msra.mxu0 %v1679_v11 }
 0x2b1   : > { %1682 = vmatprep.subr.bf16.mxu0 %v1681_v14 }
 0x2b4   : > { %1684 = vmatpush1.bf16.msra.mxu0 %v1683_v47 }
 0x2b5   : > { %1686 = vmatprep.subr.bf16.mxu0 %v1685_v49 }
 0x2b8   : > { %1688 = vmatpush1.bf16.msra.mxu0 %v1687_v24 }
 0x2b9   : > { %1690 = vmatprep.subr.bf16.mxu0 %v1689_v61 }
 0x2bc   : > { %1692 = vmatpush1.bf16.msra.mxu0 %v1691_v1 }
 0x318   : > { %v797_v3 = vpop.f32.mrb[8].mxu1 }
 0x319   : > { %v799_v4 = vpop.f32.mrb[9].mxu1  ;;  %v891_v7 = vsub.f32 %v2279_v41, %v797_v3  ;;  %v1246_v3 = vand.u32 127, %v437_v29 }
 0x31a   : > { %v892_v8 = vsub.f32 %v2277_v40, %v799_v4  ;;  %v967_v40 = vld [vmem:[%s2412_s4] sm:$0x3] }
 0x31b   : > { %v976_v27 = vrot.slane %v967_v40, %v2268_v31  ;;  %vm1247_vm1 = vcmp.eq.s32.totalorder %v1246_v3, 0 }
 0x31c   : > { %v803_v5 = vpop.f32.mrb[10].mxu1 }
 0x31d   : > { %v805_v6 = vpop.f32.mrb[11].mxu1  ;;  %v893_v15 = vsub.f32 %v2282_v43, %v803_v5  ;;  %v1056_v43 = vld [vmem:[%s2413_s5] sm:$0x3] }
 0x31e   : > { %v894_v16 = vsub.f32 %v2285_v45, %v805_v6  ;;  %v972_v45 = vrot.slane %v967_v40, %v2273_v33  ;;  %v1061_v30 = vrot.slane %v1056_v43, %v2273_v33  ;;  %v1065_v34 = vrot.slane %v1056_v43, %v2268_v31  ;;  %v1163_v31 = vld [vmem:[%s2416_s8] sm:$0xff] }
 0x31f   : > { %1496 = vmatprep.subr.mxu1 %v1163_v31 }
 0x347   : > { %v880_v9 = vpop.f32.mrb[12].mxu1 }
 0x348   : > { %v895_v10 = vmul.f32 %v891_v7, %v880_v9  ;;  %v882_v12 = vpop.f32.mrb[13].mxu1 }
 0x349   : > { %v896_v13 = vmul.f32 %v892_v8, %v882_v12 }
 0x34a   : > { %v899_v19 = vmax.f32 %v895_v10, 0.0 }
 0x34b   : > { %v900_v17 = vmax.f32 %v896_v13, 0.0  ;;  %v886_v18 = vpop.f32.mrb[14].mxu1 }
 0x34c   : > { %v897_v20 = vmul.f32 %v893_v15, %v886_v18  ;;  %v888_v21 = vpop.f32.mrb[15].mxu1 }
 0x34d   : > { %v898_v22 = vmul.f32 %v894_v16, %v888_v21  ;;  %1043 = vmatprep.mubr.f32.mxu0 %v900_v17 }
 0x34e   : > { %1044 = vmatmul.mubr.f32.vlgmr.msra.gmra.mrb[4].mxu0 %v899_v19  ;;  %v901_v41 = vmax.f32 %v897_v20, 0.0 }
 0x34f   : > { %v902_v25 = vmax.f32 %v898_v22, 0.0 }
 0x351   : > { %1049 = vmatprep.mubr.f32.mxu0 %v902_v25 }
 0x352   : > { %1050 = vmatmul.mubr.f32.gmra.mrb[6].mxu0 %v901_v41 }
 0x421   : > { %v1045_v32 = vpop.f32.mrb[4].mxu0 }
 0x422   : > { %v1046_v36 = vadd.f32 %v1045_v32, %v972_v45  ;;  %v1047_v37 = vpop.f32.mrb[5].mxu0 }
 0x423   : > { %v1048_v39 = vadd.f32 %v1047_v37, %v976_v27 }
 0x424   : > { %v1068_v42 = vsub.f32 %v1046_v36, %v1061_v30 }
 0x425   : > { %v1069_v44 = vsub.f32 %v1048_v39, %v1065_v34  ;;  %v1051_v46 = vpop.f32.mrb[6].mxu0 }
 0x426   : > { %v1052_v48 = vadd.f32 %v1051_v46, %v972_v45  ;;  %v1053_v50 = vpop.f32.mrb[7].mxu0  ;;  %v1072_v55 = vmul.f32 %v1068_v42, %v1068_v42 }
 0x427   : > { %v1073_v53 = vmul.f32 %v1069_v44, %v1069_v44  ;;  %v1054_v54 = vadd.f32 %v1053_v50, %v976_v27 }
 0x428   : > { %v1070_v51 = vsub.f32 %v1052_v48, %v1061_v30 }
 0x429   : > { %v1071_v58 = vsub.f32 %v1054_v54, %v1065_v34  ;;  %1140 = vmatprep.mubr.f32.mxu1 %v1073_v53 }
 0x42a   : > { %1141 = vmatmul.mubr.f32.vlgmr.msra.gmra.mrb[16].mxu1 %v1072_v55  ;;  %v1074_v33 = vmul.f32 %v1070_v51, %v1070_v51 }
 0x42b   : > { %v1075_v52 = vmul.f32 %v1071_v58, %v1071_v58  ;;  %1497 = vmatpush3.msra.mxu1 %v1163_v31 }
 0x42d   : > { %1145 = vmatprep.mubr.f32.mxu1 %v1075_v52 }
 0x42e   : > { %1146 = vmatmul.mubr.f32.gmra.mrb[18].mxu1 %v1074_v33 }
 0x4fd   : > { %v1487_v57 = vpop.f32.mrb[16].mxu1 }
 0x4fe   : > { %v1488_v63 = vpop.f32.mrb[17].mxu1 }
 0x4ff   : > { %v1489_v2 = vadd.f32 %v1488_v63, %v1487_v57 }
 0x501   : > { %v1153_v11 = vadd.f32 1e-05, %v1489_v2  ;;  %v1490_v14 = vpop.f32.mrb[18].mxu1  ;;  %v1151_v38 = vadd.f32 1.0, %v1489_v2 }
 0x502   : > { %v1491_v23 = vpop.f32.mrb[19].mxu1 }
 0x503   : > { %1794 = vrcp.f32 %v1153_v11  ;;  %v1492_v26 = vadd.f32 %v1491_v23, %v1490_v14 }
 0x505   : > { %v1154_v35 = vadd.f32 1e-05, %v1492_v26  ;;  %v1152_v60 = vadd.f32 1.0, %v1492_v26 }
 0x507   : > { %1796 = vrcp.f32 %v1154_v35 }
 0x50d   : > { %v1795_v47 = vpop.eup %1794 }
 0x50e   : > { %v1156_v49 = vmul.f32 %v1795_v47, %v1151_v38 }
 0x510   : > { %1798 = vlog2.f32 %v1156_v49 }
 0x511   : > { %v1797_v56 = vpop.eup %1796 }
 0x512   : > { %v1158_v24 = vmul.f32 %v1797_v56, %v1152_v60 }
 0x514   : > { %1800 = vlog2.f32 %v1158_v24 }
 0x51a   : > { %v1799_v28 = vpop.eup %1798 }
 0x51b   : > { %v1160_v59 = vmul.f32 0.6931472, %v1799_v28 }
 0x51d   : > { %1498 = vmatprep.mubr.msk.f32.mxu1 %vm724_vm0, %v1160_v59 }
 0x51e   : > { %v1801_v61 = vpop.eup %1800 }
 0x51f   : > { %v1162_v62 = vmul.f32 0.6931472, %v1801_v61 }
 0x521   : > { %1499 = vmatmul.mubr.msk.f32.vlgmr.msra.gmra.mrb[20].mxu1 %vm724_vm0, %v1162_v62 }
 0x5f4   : > { %v1500_v0 = vpop.f32.mrb[20].mxu1 }
 0x5f5   : > { %1802 = vtanh.f32 %v1500_v0  ;;  %v1236_v1 = vpop.f32.mrb[21].mxu1  ;;  %v1251_v4 = vmax.f32 %v1500_v0, 0.0 }
 0x5f6   : > { %1804 = vtanh.f32 %v1236_v1  ;;  %v1250_v6 = vmax.f32 %v1236_v1, 0.0 }
 0x5ff   : > { %v1803_v5 = vpop.eup %1802 }
 0x600   : > { %v1805_v7 = vpop.eup %1804  ;;  %v1253_v29 = vsel %vm1247_vm1, %v1803_v5, %v1251_v4 }
 0x601   : > { %1255 = vst [vmem:[%s358_s23 + $0x8] sm:$0xff] %v1253_v29  ;;  %v1252_v8 = vsel %vm1247_vm1, %v1805_v7, %v1250_v6 }
 0x602   : > { %1254 = vst [vmem:[%s358_s23] sm:$0xff] %v1252_v8 }
 0x603   : > { %1875 = shalt.err (!%p1872_p11)
}
 0x604   : > { %s1876_s14 = scalar_lea.hbm %s2365_s21, 256  ;;  %s1880_s22 = scalar_lea.hbm %s2417_s9, 1024 }
 0x605   : > { %p1877_p13 = scmp.ne.s32.totalorder %s2365_s21, %s1876_s14  ;;  %p1881_p6 = scmp.lt.u32.totalorder %s2365_s21, %s2417_s9 }
 0x606   : > { %p1882_p9 = scmp.lt.u32.totalorder %s1880_s22, %s1876_s14  ;;  %p1884_p10 = scmp.lt.u32.totalorder %s1876_s14, %s2365_s21 }
 0x607   : > { %p1878_p5 = pnand %p1877_p13, %p2436_p1 }
 0x608   : > { %p1883_p12 = por %p1882_p9, %p1881_p6 }
 0x609   : > { %p1879_p0 = pneg %p1878_p5 }
 0x60a   : > { %p1885_p2 = por %p1884_p10, %p1883_p12 }
 0x60c   : > { %p1886_p3 = pnand %p1885_p2, %p1879_p0 }
 0x60e   : > { %1889 = shalt.err (!%p1886_p3)
}
 0x60f   : > { %s1940_s11 = smov 128   ;;  %s1941_s15 = smov 8  }
 0x610   : > { %1733 = dma.vmem_to_hbm [thread:$0]  (%p2436_p1), %s2360_s27, 256, %s2365_s21, %s2367_s13, %s1940_s11, %s1940_s11, %s1941_s15  }
 0x611 PF: > { %p1750_p4 = scmp.ge.s32.totalorder %s1932_s12, 2  ;;  %s1285_s18 = sand.u32 1, %s1920_s30  }
 0x612   : > { %p2437_p7 = scmp.ne.s32.totalorder %s2428_s20, 0  ;;  %s1286_s24 = scalar_lea.sflag [#allocation4], %s1285_s18 }
 0x614   : > { %p1743_p8 = pnand %p1750_p4, %p2437_p7 }
 0x616   : > { %1915 = dma.done.wait (!%p1743_p8), %s1286_s24, 256  }
 0x617   : > { %1917 = vsyncadd (!%p1743_p8), %s1286_s24, 4294967040  ;;  %s2438_s12 = sld [smem:[#allocation12_spill]]  ;;  %s2439_s26 = sld [smem:[#allocation11_spill]] }
 0x618   : > { %s2440_s11 = sld [smem:[#allocation13_spill]]  ;;  %s2441_s30 = smov %s1924_s10 }
 0x61d   : > { %p21_p11 = scmp.ge.s32.totalorder %s2438_s12, 6   ;;  %s2442_s10 = smov %s2439_s26 }
 0x61f   :  { %23 = sbr.rel (!%p21_p11) target bundleno = 5 (0x5), region = 100 }
 0x626   :  { %1291 = vsyncpa [#allocation3], 1 }
 0x627   :  { %1293 = vsyncpa [#allocation3 + $0x1], 1 }
 0x628   :  { %1294 = vsyncpa [#allocation6], 1 }
 0x629   :  { %1295 = vsyncpa [#allocation4], 1 }
 0x62a   :  { %1297 = vsyncpa [#allocation4 + $0x1], 1 }

</bundles_post_ra>
